<compile_context>
chip_gen: v5e
topology: v5e:2x2
jax: 0.10.0
libtpu: 0.0.40
codegen_flags: <defaults>
</compile_context>

<pallas_src>
import functools

import jax
import jax.numpy as jnp
from jax import lax
from jax.experimental import pallas as pl
from jax.experimental.pallas import tpu as pltpu

SUBLANE = 8
LANE = 128
BLOCK_ROWS = 1024          # (1024, 128) f32 = 512 KiB per input block
NUM_CORE_SPLITS = 2        # v7x megacore split; harmless on 1-TC chips


def _round_up(x, m):
    return -(-x // m) * m


def _cdiv(a, b):
    return -(-a // b)


def _loss_partials_kernel(pred_ref, true_ref, out_ref,
                          acc_abs, acc_sq, m_acc, s_acc, *,
                          n_full_rows, n_rem, blocks_per_core,
                          max_error_beta, needs_mask):
    c = pl.program_id(0)          # core-split index   ("parallel")
    i = pl.program_id(1)          # reduction step     ("arbitrary")

    @pl.when(i == 0)
    def _init():
        acc_abs[...] = jnp.zeros_like(acc_abs)
        acc_sq[...] = jnp.zeros_like(acc_sq)
        # beta * |d| >= 0 always, so 0 is a valid lower bound for the max.
        m_acc[...] = jnp.zeros_like(m_acc)
        s_acc[...] = jnp.zeros_like(s_acc)

    br, lanes = pred_ref.shape
    p = pred_ref[...].astype(jnp.float32)
    t = true_ref[...].astype(jnp.float32)
    d = p - t
    ad = jnp.abs(d)
    sq = d * d
    x = max_error_beta * ad                      # >= 0 for valid elements

    if needs_mask:
        # Logical (unclamped) block index -> global row ids; elements past the
        # real input length contribute 0 (abs/sq) or exp(-inf)=0 (smooth max).
        blk = c * blocks_per_core + i
        row0 = blk * br
        grow = row0 + lax.broadcasted_iota(jnp.int32, (br, lanes), 0)
        valid = grow < n_full_rows
        if n_rem:
            lane_ids = lax.broadcasted_iota(jnp.int32, (br, lanes), 1)
            valid = valid | ((grow == n_full_rows) & (lane_ids < n_rem))
        ad = jnp.where(valid, ad, 0.0)
        sq = jnp.where(valid, sq, 0.0)
        x = jnp.where(valid, x, -jnp.inf)

    k = br // SUBLANE
    ad3 = ad.reshape(k, SUBLANE, lanes)
    sq3 = sq.reshape(k, SUBLANE, lanes)
    x3 = x.reshape(k, SUBLANE, lanes)

    # Elementwise (VPU) accumulation into (8, 128) scratch accumulators.
    acc_abs[...] += jnp.sum(ad3, axis=0)
    acc_sq[...] += jnp.sum(sq3, axis=0)

    # Streaming logsumexp per (sublane, lane) slot: overflow-safe smooth max.
    blk_max = jnp.max(x3, axis=0)
    new_m = jnp.maximum(m_acc[...], blk_max)
    s_acc[...] = (s_acc[...] * jnp.exp(m_acc[...] - new_m)
                  + jnp.sum(jnp.exp(x3 - new_m[None]), axis=0))
    m_acc[...] = new_m

    @pl.when(i == pl.num_programs(1) - 1)
    def _finalize():
        out_ref[0, 0, :, :] = acc_abs[...]
        out_ref[0, 1, :, :] = acc_sq[...]
        out_ref[0, 2, :, :] = m_acc[...]
        out_ref[0, 3, :, :] = s_acc[...]


def combined_regression_loss(y_pred, y_true, *, alpha=0.2, beta=0.2, gamma=0.6,
                             max_error_beta=10.0):
    """JAX/Pallas equivalent of CombinedRegressionLoss.forward."""
    assert y_pred.shape == y_true.shape
    n = int(y_pred.size)
    assert n > 0

    p = jnp.reshape(y_pred, (-1,))
    t = jnp.reshape(y_true, (-1,))

    rows = _cdiv(n, LANE)
    lane_pad = rows * LANE - n
    if lane_pad:
        p = jnp.pad(p, (0, lane_pad))
        t = jnp.pad(t, (0, lane_pad))
    p2 = p.reshape(rows, LANE)
    t2 = t.reshape(rows, LANE)

    # Block of up to BLOCK_ROWS rows (multiple of 8 for the in-kernel reshape).
    br = min(BLOCK_ROWS, _round_up(rows, SUBLANE))
    # Only tiny (sub-block) inputs ever need a row pad so the single block
    # never exceeds the array extent; large inputs use partial last blocks.
    row_pad = br - rows if rows < br else 0
    if row_pad:
        p2 = jnp.pad(p2, ((0, row_pad), (0, 0)))
        t2 = jnp.pad(t2, ((0, row_pad), (0, 0)))
    rows_p = rows + row_pad

    num_blocks = _cdiv(rows_p, br)
    nc = NUM_CORE_SPLITS if num_blocks >= NUM_CORE_SPLITS else 1
    bpc = _cdiv(num_blocks, nc)
    needs_mask = ((rows_p * LANE != n)            # padded tail elements
                  or (rows_p % br != 0)           # partial last block
                  or (nc * bpc != num_blocks))    # duplicated (clamped) block

    kernel = functools.partial(
        _loss_partials_kernel,
        n_full_rows=n // LANE, n_rem=n % LANE,
        blocks_per_core=bpc, max_error_beta=float(max_error_beta),
        needs_mask=needs_mask)

    def in_map(c, i):
        # Clamp so the DMA never targets a fully out-of-range block; the
        # in-kernel mask (computed from the *unclamped* index) zeroes any
        # duplicated block's contribution.
        return (jnp.minimum(c * bpc + i, num_blocks - 1), 0)

    in_spec = pl.BlockSpec((br, LANE), in_map)
    out_spec = pl.BlockSpec((1, 4, SUBLANE, LANE), lambda c, i: (c, 0, 0, 0))

    out = pl.pallas_call(
        kernel,
        out_shape=jax.ShapeDtypeStruct((nc, 4, SUBLANE, LANE), jnp.float32),
        grid_spec=pltpu.PrefetchScalarGridSpec(
            num_scalar_prefetch=0,
            grid=(nc, bpc),
            in_specs=[in_spec, in_spec],
            out_specs=out_spec,
            scratch_shapes=[pltpu.VMEM((SUBLANE, LANE), jnp.float32)
                            for _ in range(4)],
        ),
        compiler_params=pltpu.CompilerParams(
            dimension_semantics=("parallel", "arbitrary"),
            vmem_limit_bytes=32 * 1024 * 1024),
    )(p2, t2)

    # Final tiny cross-lane reductions on the (nc, 4, 8, 128) slab.
    sum_abs = jnp.sum(out[:, 0])
    sum_sq = jnp.sum(out[:, 1])
    m = out[:, 2]
    s = out[:, 3]
    m_glob = jnp.max(m)
    total = jnp.sum(jnp.exp(m - m_glob) * s)     # = sum(exp(beta*|d|)) / exp(m_glob)
    max_error_loss = (m_glob + jnp.log(total)) / max_error_beta

    mae_loss = sum_abs / n
    mse_loss = sum_sq / n
    return alpha * mae_loss + beta * mse_loss + gamma * max_error_loss


def _reference(y_pred, y_true, alpha=0.2, beta=0.2, gamma=0.6, max_error_beta=10.0):
    d = jnp.asarray(y_pred, jnp.float32) - jnp.asarray(y_true, jnp.float32)
    mae = jnp.mean(jnp.abs(d))
    mse = jnp.mean(d * d)
    mx = jnp.log(jnp.sum(jnp.exp(max_error_beta * jnp.abs(d)))) / max_error_beta
    return alpha * mae + beta * mse + gamma * mx


if __name__ == "__main__":
    key = jax.random.PRNGKey(0)

    # Primary NCHW regression-head shape, a ragged shape (in-kernel mask path),
    # and a 2-block shape (core-split + partial last block path).
    for shape in [(2, 4, 16, 16), (3, 5, 7), (2, 4, 128, 130)]:
        key, k1, k2 = jax.random.split(key, 3)
        y_pred = jax.random.normal(k1, shape, dtype=jnp.float32) * 0.1
        y_true = jax.random.normal(k2, shape, dtype=jnp.float32) * 0.1

        loss = jax.block_until_ready(combined_regression_loss(y_pred, y_true))
        ref = jax.block_until_ready(_reference(y_pred, y_true))
        assert jnp.allclose(loss, ref, rtol=1e-5, atol=1e-5), (shape, loss, ref)

    print("KERNEL_OK")
</pallas_src>

<mosaic_0001>
module attributes {stable_mosaic.version = 11 : i64} {
  func.func @_loss_partials_kernel(%arg0: i32, %arg1: i32, %arg2: memref<16x128xf32, #tpu.memory_space<vmem>>, %arg3: memref<16x128xf32, #tpu.memory_space<vmem>>, %arg4: memref<1x4x8x128xf32, #tpu.memory_space<vmem>>, %arg5: memref<8x128xf32, #tpu.memory_space<vmem>>, %arg6: memref<8x128xf32, #tpu.memory_space<vmem>>, %arg7: memref<8x128xf32, #tpu.memory_space<vmem>>, %arg8: memref<8x128xf32, #tpu.memory_space<vmem>>) attributes {dimension_semantics = [#tpu.dimension_semantics<parallel>, #tpu.dimension_semantics<arbitrary>], iteration_bounds = array<i64: 1, 1>, scalar_prefetch = 0 : i64, scratch_operands = 4 : i64, tpu.core_type = #tpu.core_type<tc>, window_params = [{transform_indices = @transform_0, window_bounds = array<i64: 16, 128>}, {transform_indices = @transform_1, window_bounds = array<i64: 16, 128>}, {transform_indices = @transform_2, window_bounds = array<i64: 1, 4, 8, 128>}]} {
    %c0_i32 = arith.constant 0 : i32
    %0 = arith.cmpi eq, %arg1, %c0_i32 : i32
    %1 = arith.extui %0 : i1 to i32
    %c0_i32_0 = arith.constant 0 : i32
    %2 = arith.cmpi ne, %1, %c0_i32_0 : i32
    scf.if %2 {
      %cst_28 = arith.constant 0.000000e+00 : f32
      %40 = vector.broadcast %cst_28 : f32 to vector<8x128xf32>
      %c0_29 = arith.constant 0 : index
      %c0_30 = arith.constant 0 : index
      %41 = vector.load %arg5[%c0_29, %c0_30] : memref<8x128xf32, #tpu.memory_space<vmem>>, vector<8x128xf32>
      tpu.vector_store %arg5[%c0_29, %c0_30], %40 {strides = array<i32>} : memref<8x128xf32, #tpu.memory_space<vmem>>, vector<8x128xf32>,
      %cst_31 = arith.constant 0.000000e+00 : f32
      %42 = vector.broadcast %cst_31 : f32 to vector<8x128xf32>
      %c0_32 = arith.constant 0 : index
      %c0_33 = arith.constant 0 : index
      %43 = vector.load %arg6[%c0_32, %c0_33] : memref<8x128xf32, #tpu.memory_space<vmem>>, vector<8x128xf32>
      tpu.vector_store %arg6[%c0_32, %c0_33], %42 {strides = array<i32>} : memref<8x128xf32, #tpu.memory_space<vmem>>, vector<8x128xf32>,
      %cst_34 = arith.constant 0.000000e+00 : f32
      %44 = vector.broadcast %cst_34 : f32 to vector<8x128xf32>
      %c0_35 = arith.constant 0 : index
      %c0_36 = arith.constant 0 : index
      %45 = vector.load %arg7[%c0_35, %c0_36] : memref<8x128xf32, #tpu.memory_space<vmem>>, vector<8x128xf32>
      tpu.vector_store %arg7[%c0_35, %c0_36], %44 {strides = array<i32>} : memref<8x128xf32, #tpu.memory_space<vmem>>, vector<8x128xf32>,
      %cst_37 = arith.constant 0.000000e+00 : f32
      %46 = vector.broadcast %cst_37 : f32 to vector<8x128xf32>
      %c0_38 = arith.constant 0 : index
      %c0_39 = arith.constant 0 : index
      %47 = vector.load %arg8[%c0_38, %c0_39] : memref<8x128xf32, #tpu.memory_space<vmem>>, vector<8x128xf32>
      tpu.vector_store %arg8[%c0_38, %c0_39], %46 {strides = array<i32>} : memref<8x128xf32, #tpu.memory_space<vmem>>, vector<8x128xf32>,
    } else {
    }
    %c0 = arith.constant 0 : index
    %c0_1 = arith.constant 0 : index
    %3 = vector.load %arg2[%c0, %c0_1] : memref<16x128xf32, #tpu.memory_space<vmem>>, vector<16x128xf32>
    %c0_2 = arith.constant 0 : index
    %c0_3 = arith.constant 0 : index
    %4 = vector.load %arg3[%c0_2, %c0_3] : memref<16x128xf32, #tpu.memory_space<vmem>>, vector<16x128xf32>
    %5 = arith.subf %3, %4 : vector<16x128xf32>
    %6 = math.absf %5 : vector<16x128xf32>
    %7 = arith.mulf %5, %5 : vector<16x128xf32>
    %cst = arith.constant 1.000000e+01 : f32
    %8 = vector.broadcast %cst : f32 to vector<16x128xf32>
    %9 = arith.mulf %8, %6 : vector<16x128xf32>
    %10 = vector.shape_cast %6 : vector<16x128xf32> to vector<2x8x128xf32>
    %11 = vector.shape_cast %7 : vector<16x128xf32> to vector<2x8x128xf32>
    %12 = vector.shape_cast %9 : vector<16x128xf32> to vector<2x8x128xf32>
    %c0_4 = arith.constant 0 : index
    %c0_5 = arith.constant 0 : index
    %13 = vector.load %arg5[%c0_4, %c0_5] : memref<8x128xf32, #tpu.memory_space<vmem>>, vector<8x128xf32>
    %cst_6 = arith.constant dense<0.000000e+00> : vector<8x128xf32>
    %14 = vector.multi_reduction <add>, %10, %cst_6 [0] : vector<2x8x128xf32> to vector<8x128xf32>
    %15 = arith.addf %13, %14 : vector<8x128xf32>
    %c0_7 = arith.constant 0 : index
    %c0_8 = arith.constant 0 : index
    %16 = vector.load %arg5[%c0_7, %c0_8] : memref<8x128xf32, #tpu.memory_space<vmem>>, vector<8x128xf32>
    tpu.vector_store %arg5[%c0_7, %c0_8], %15 {strides = array<i32>} : memref<8x128xf32, #tpu.memory_space<vmem>>, vector<8x128xf32>,
    %c0_9 = arith.constant 0 : index
    %c0_10 = arith.constant 0 : index
    %17 = vector.load %arg6[%c0_9, %c0_10] : memref<8x128xf32, #tpu.memory_space<vmem>>, vector<8x128xf32>
    %cst_11 = arith.constant dense<0.000000e+00> : vector<8x128xf32>
    %18 = vector.multi_reduction <add>, %11, %cst_11 [0] : vector<2x8x128xf32> to vector<8x128xf32>
    %19 = arith.addf %17, %18 : vector<8x128xf32>
    %c0_12 = arith.constant 0 : index
    %c0_13 = arith.constant 0 : index
    %20 = vector.load %arg6[%c0_12, %c0_13] : memref<8x128xf32, #tpu.memory_space<vmem>>, vector<8x128xf32>
    tpu.vector_store %arg6[%c0_12, %c0_13], %19 {strides = array<i32>} : memref<8x128xf32, #tpu.memory_space<vmem>>, vector<8x128xf32>,
    %cst_14 = arith.constant dense<0xFF800000> : vector<8x128xf32>
    %21 = vector.multi_reduction <maximumf>, %12, %cst_14 [0] : vector<2x8x128xf32> to vector<8x128xf32>
    %c0_15 = arith.constant 0 : index
    %c0_16 = arith.constant 0 : index
    %22 = vector.load %arg7[%c0_15, %c0_16] : memref<8x128xf32, #tpu.memory_space<vmem>>, vector<8x128xf32>
    %23 = arith.maximumf %22, %21 : vector<8x128xf32>
    %c0_17 = arith.constant 0 : index
    %c0_18 = arith.constant 0 : index
    %24 = vector.load %arg8[%c0_17, %c0_18] : memref<8x128xf32, #tpu.memory_space<vmem>>, vector<8x128xf32>
    %c0_19 = arith.constant 0 : index
    %c0_20 = arith.constant 0 : index
    %25 = vector.load %arg7[%c0_19, %c0_20] : memref<8x128xf32, #tpu.memory_space<vmem>>, vector<8x128xf32>
    %26 = arith.subf %25, %23 : vector<8x128xf32>
    %27 = math.exp %26 : vector<8x128xf32>
    %28 = arith.mulf %24, %27 : vector<8x128xf32>
    %29 = vector.shape_cast %23 : vector<8x128xf32> to vector<1x8x128xf32>
    %30 = vector.broadcast %29 : vector<1x8x128xf32> to vector<2x8x128xf32>
    %31 = arith.subf %12, %30 : vector<2x8x128xf32>
    %32 = math.exp %31 : vector<2x8x128xf32>
    %cst_21 = arith.constant dense<0.000000e+00> : vector<8x128xf32>
    %33 = vector.multi_reduction <add>, %32, %cst_21 [0] : vector<2x8x128xf32> to vector<8x128xf32>
    %34 = arith.addf %28, %33 : vector<8x128xf32>
    %c0_22 = arith.constant 0 : index
    %c0_23 = arith.constant 0 : index
    %35 = vector.load %arg8[%c0_22, %c0_23] : memref<8x128xf32, #tpu.memory_space<vmem>>, vector<8x128xf32>
    tpu.vector_store %arg8[%c0_22, %c0_23], %34 {strides = array<i32>} : memref<8x128xf32, #tpu.memory_space<vmem>>, vector<8x128xf32>,
    %c0_24 = arith.constant 0 : index
    %c0_25 = arith.constant 0 : index
    %36 = vector.load %arg7[%c0_24, %c0_25] : memref<8x128xf32, #tpu.memory_space<vmem>>, vector<8x128xf32>
    tpu.vector_store %arg7[%c0_24, %c0_25], %23 {strides = array<i32>} : memref<8x128xf32, #tpu.memory_space<vmem>>, vector<8x128xf32>,
    %c0_i32_26 = arith.constant 0 : i32
    %37 = arith.cmpi eq, %arg1, %c0_i32_26 : i32
    %38 = arith.extui %37 : i1 to i32
    %c0_i32_27 = arith.constant 0 : i32
    %39 = arith.cmpi ne, %38, %c0_i32_27 : i32
    scf.if %39 {
      %c0_28 = arith.constant 0 : index
      %c0_29 = arith.constant 0 : index
      %40 = vector.load %arg5[%c0_28, %c0_29] : memref<8x128xf32, #tpu.memory_space<vmem>>, vector<8x128xf32>
      %c0_30 = arith.constant 0 : index
      %c0_31 = arith.constant 0 : index
      %c0_32 = arith.constant 0 : index
      %c0_33 = arith.constant 0 : index
      %41 = vector.load %arg4[%c0_30, %c0_31, %c0_32, %c0_33] : memref<1x4x8x128xf32, #tpu.memory_space<vmem>>, vector<1x1x8x128xf32>
      %42 = vector.shape_cast %41 : vector<1x1x8x128xf32> to vector<8x128xf32>
      %43 = vector.shape_cast %40 : vector<8x128xf32> to vector<1x1x8x128xf32>
      tpu.vector_store %arg4[%c0_30, %c0_31, %c0_32, %c0_33], %43 {strides = array<i32>} : memref<1x4x8x128xf32, #tpu.memory_space<vmem>>, vector<1x1x8x128xf32>,
      %c0_34 = arith.constant 0 : index
      %c0_35 = arith.constant 0 : index
      %44 = vector.load %arg6[%c0_34, %c0_35] : memref<8x128xf32, #tpu.memory_space<vmem>>, vector<8x128xf32>
      %c0_36 = arith.constant 0 : index
      %c1 = arith.constant 1 : index
      %c0_37 = arith.constant 0 : index
      %c0_38 = arith.constant 0 : index
      %45 = vector.load %arg4[%c0_36, %c1, %c0_37, %c0_38] : memref<1x4x8x128xf32, #tpu.memory_space<vmem>>, vector<1x1x8x128xf32>
      %46 = vector.shape_cast %45 : vector<1x1x8x128xf32> to vector<8x128xf32>
      %47 = vector.shape_cast %44 : vector<8x128xf32> to vector<1x1x8x128xf32>
      tpu.vector_store %arg4[%c0_36, %c1, %c0_37, %c0_38], %47 {strides = array<i32>} : memref<1x4x8x128xf32, #tpu.memory_space<vmem>>, vector<1x1x8x128xf32>,
      %c0_39 = arith.constant 0 : index
      %c0_40 = arith.constant 0 : index
      %48 = vector.load %arg7[%c0_39, %c0_40] : memref<8x128xf32, #tpu.memory_space<vmem>>, vector<8x128xf32>
      %c0_41 = arith.constant 0 : index
      %c2 = arith.constant 2 : index
      %c0_42 = arith.constant 0 : index
      %c0_43 = arith.constant 0 : index
      %49 = vector.load %arg4[%c0_41, %c2, %c0_42, %c0_43] : memref<1x4x8x128xf32, #tpu.memory_space<vmem>>, vector<1x1x8x128xf32>
      %50 = vector.shape_cast %49 : vector<1x1x8x128xf32> to vector<8x128xf32>
      %51 = vector.shape_cast %48 : vector<8x128xf32> to vector<1x1x8x128xf32>
      tpu.vector_store %arg4[%c0_41, %c2, %c0_42, %c0_43], %51 {strides = array<i32>} : memref<1x4x8x128xf32, #tpu.memory_space<vmem>>, vector<1x1x8x128xf32>,
      %c0_44 = arith.constant 0 : index
      %c0_45 = arith.constant 0 : index
      %52 = vector.load %arg8[%c0_44, %c0_45] : memref<8x128xf32, #tpu.memory_space<vmem>>, vector<8x128xf32>
      %c0_46 = arith.constant 0 : index
      %c3 = arith.constant 3 : index
      %c0_47 = arith.constant 0 : index
      %c0_48 = arith.constant 0 : index
      %53 = vector.load %arg4[%c0_46, %c3, %c0_47, %c0_48] : memref<1x4x8x128xf32, #tpu.memory_space<vmem>>, vector<1x1x8x128xf32>
      %54 = vector.shape_cast %53 : vector<1x1x8x128xf32> to vector<8x128xf32>
      %55 = vector.shape_cast %52 : vector<8x128xf32> to vector<1x1x8x128xf32>
      tpu.vector_store %arg4[%c0_46, %c3, %c0_47, %c0_48], %55 {strides = array<i32>} : memref<1x4x8x128xf32, #tpu.memory_space<vmem>>, vector<1x1x8x128xf32>,
    } else {
    }
    return
  }
  func.func @transform_0(%arg0: i32, %arg1: i32) -> (i32, i32) {
    %c1_i32 = arith.constant 1 : i32
    %0 = arith.muli %arg0, %c1_i32 : i32
    %1 = arith.addi %0, %arg1 : i32
    %c0_i32 = arith.constant 0 : i32
    %2 = arith.minsi %1, %c0_i32 : i32
    %c0_i32_0 = arith.constant 0 : i32
    %c0_i32_1 = arith.constant 0 : i32
    return %2, %c0_i32_0 : i32, i32
  }
  func.func @transform_1(%arg0: i32, %arg1: i32) -> (i32, i32) {
    %c1_i32 = arith.constant 1 : i32
    %0 = arith.muli %arg0, %c1_i32 : i32
    %1 = arith.addi %0, %arg1 : i32
    %c0_i32 = arith.constant 0 : i32
    %2 = arith.minsi %1, %c0_i32 : i32
    %c0_i32_0 = arith.constant 0 : i32
    %c0_i32_1 = arith.constant 0 : i32
    return %2, %c0_i32_0 : i32, i32
  }
  func.func @transform_2(%arg0: i32, %arg1: i32) -> (i32, i32, i32, i32) {
    %c0_i32 = arith.constant 0 : i32
    %c0_i32_0 = arith.constant 0 : i32
    %c0_i32_1 = arith.constant 0 : i32
    %c0_i32_2 = arith.constant 0 : i32
    return %arg0, %c0_i32, %c0_i32_0, %c0_i32_1 : i32, i32, i32, i32
  }
}

</mosaic_0001>

<bundles_post_ra>
// kernel: tpu_custom_call.1
= control target key start
LH: loop header
LB: loop body
LE: loop exit
PB: predicated region body
PF: predicated region fallthrough
CT: control target
= control target key end

     0   :  { %7 = vsyncpa [#allocation7], 0  ;;  %s275_s0 = inlined_call_operand.hbm [shape: f32[16,128], index: 0, kind: input, shape index: {}]   ;;  %s276_s1 = inlined_call_operand.hbm [shape: f32[16,128], index: 1, kind: input, shape index: {}]   ;;  %s277_s2 = inlined_call_operand.hbm [shape: f32[1,4,8,128], index: 2, kind: output, shape index: {}]  }
   0x1   :  { %8 = vsyncpa [#allocation10], 0 }
   0x2   :  { %9 = vsyncpa [#allocation8], 0  ;;  %s20_s11 = sshll.u32 %s275_s0, 4  ;;  %s237_s12 = smov [#allocation6]   ;;  %s21_s11 = int_to_ptr.hbm [resolvable:$true] %s20_s11 }
   0x3   :  { %s22_s13 = sshll.u32 %s237_s12, 4  ;;  %s39_s16 = sshll.u32 %s276_s1, 4  ;;  %s23_s13 = int_to_ptr.vmem [resolvable:$true] %s22_s13  ;;  %s40_s16 = int_to_ptr.hbm [resolvable:$true] %s39_s16 }
   0x4   :  { %s238_s17 = smov 128   ;;  %s239_s18 = smov 8  }
   0x5   :  { %28 = dma.hbm_to_vmem [thread:$0]  %s21_s11, 256, %s23_s13, [#allocation7], %s238_s17, %s238_s17, %s239_s18  }
   0x6   :  { %s240_s19 = smov [#allocation9]  }
   0x7   :  { %s41_s20 = sshll.u32 %s240_s19, 4  ;;  %s42_s20 = int_to_ptr.vmem [resolvable:$true] %s41_s20 }
   0x8   :  { %47 = dma.hbm_to_vmem [thread:$0]  %s40_s16, 256, %s42_s20, [#allocation10], %s238_s17, %s238_s17, %s239_s18  }
   0x9   :  { %231 = dma.done.wait [#allocation7], 256  }
   0xa   :  { %232 = vsyncadd [#allocation7], 4294967040 }
   0xb   :  { %233 = dma.done.wait [#allocation10], 256  }
   0xc   :  { %234 = vsyncadd [#allocation10], 4294967040  ;;  %v72_v0 = vld [vmem:[#allocation6] sm:$0xff]  ;;  %v73_v1 = vld [vmem:[#allocation6 + $0x8] sm:$0xff]  ;;  %s241_s0 = smov [#allocation11]   ;;  %s130_s23 = sshll.u32 %s277_s2, 4  ;;  %s131_s23 = int_to_ptr.hbm [resolvable:$true] %s130_s23 }
   0xd   :  { %v74_v2 = vld [vmem:[#allocation9] sm:$0xff]  ;;  %v75_v3 = vld [vmem:[#allocation9 + $0x8] sm:$0xff]  ;;  %s128_s1 = sshll.u32 %s241_s0, 4  ;;  %s129_s1 = int_to_ptr.vmem [resolvable:$true] %s128_s1 }
   0xe   :  { %v76_v4 = vsub.f32 %v72_v0, %v74_v2  ;;  %v77_v5 = vsub.f32 %v73_v1, %v75_v3 }
  0x10   :  { %v78_v6 = vand.u32 2147483647, %v76_v4  ;;  %v80_v7 = vmul.f32 %v76_v4, %v76_v4  ;;  %v79_v8 = vand.u32 2147483647, %v77_v5  ;;  %v81_v9 = vmul.f32 %v77_v5, %v77_v5 }
  0x12   :  { %v82_v10 = vmul.f32 10.0, %v78_v6  ;;  %v83_v11 = vmul.f32 10.0, %v79_v8  ;;  %v85_v12 = vadd.f32 %v79_v8, %v78_v6  ;;  %v89_v13 = vadd.f32 %v81_v9, %v80_v7 }
  0x14   :  { %v92_v14 = vmax.f32 %v82_v10, %v83_v11  ;;  %114 = vst [vmem:[#allocation11] sm:$0xff] %v85_v12 }
  0x15   :  { %117 = vst [vmem:[#allocation11 + $0x8] sm:$0xff] %v89_v13 }
  0x16   :  { %v94_v15 = vmax.f32 %v92_v14, 0.0 }
  0x18   :  { %v100_v16 = vsub.f32 %v82_v10, %v94_v15  ;;  %v101_v17 = vsub.f32 %v83_v11, %v94_v15  ;;  %120 = vst [vmem:[#allocation11 + $0x10] sm:$0xff] %v94_v15  ;;  %v96_v18 = vsub.f32 0.0, %v94_v15 }
  0x1a   :  { %v102_v19 = vmul.f32 1.442695, %v100_v16  ;;  %v104_v20 = vmul.f32 1.442695, %v101_v17  ;;  %v97_v21 = vmul.f32 1.442695, %v96_v18 }
  0x1c   :  { %153 = vpow2.f32 %v102_v19 }
  0x1d   :  { %155 = vpow2.f32 %v104_v20 }
  0x1e   :  { %157 = vpow2.f32 %v97_v21 }
  0x22   :  { %v154_v22 = vpop.eup %153 }
  0x23   :  { %v156_v23 = vpop.eup %155 }
  0x24   :  { %v158_v24 = vpop.eup %157  ;;  %v106_v25 = vadd.f32 %v156_v23, %v154_v22 }
  0x25   :  { %v99_v26 = vmul.f32 0.0, %v158_v24 }
  0x27   :  { %v107_v27 = vadd.f32 %v106_v25, %v99_v26 }
  0x29   :  { %123 = vst [vmem:[#allocation11 + $0x18] sm:$0xff] %v107_v27 }
  0x2a   :  { %136 = dma.vmem_to_hbm [thread:$0]  %s129_s1, 512, %s131_s23, [#allocation8], %s238_s17, %s238_s17, %s239_s18  }
  0x2b   :  { %235 = dma.done.wait [#allocation8], 512  }
  0x2c   :  { %236 = vsyncadd [#allocation8], 4294966784 }
  0x2d   :  { %141 = vsyncpa [#allocation7], 1 }
  0x2e   :  { %142 = vsyncpa [#allocation10], 1 }
  0x2f   :  { %143 = vsyncpa [#allocation8], 1 }

</bundles_post_ra>
